<compile_context>
chip_gen: v7x
topology: tpu7x:2x2x1
jax: 0.10.0
libtpu: 0.0.40
codegen_flags: <defaults>
</compile_context>

<pallas_src>
from functools import partial

import jax
import jax.numpy as jnp
from jax.experimental import pallas as pl
from jax.experimental.pallas import tpu as pltpu


def _fc_log_softmax_kernel(x_ref, w_ref, b_ref, out_ref):
    # x_ref: (TB, H), w_ref: (H, A_pad), b_ref: (1, A_pad), out_ref: (TB, A_pad)
    logits = jnp.dot(x_ref[...], w_ref[...],
                     preferred_element_type=jnp.float32) + b_ref[...]
    # Numerically stable log-softmax along the action (lane) axis.  Padded
    # action lanes carry bias = -1e30, so they never win the max and their
    # exp underflows to 0 in the sum.
    m = jnp.max(logits, axis=1, keepdims=True)
    shifted = logits - m
    lse = jnp.log(jnp.sum(jnp.exp(shifted), axis=1, keepdims=True))
    out_ref[...] = shifted - lse


def prepare_fc_params(fc_weight, fc_bias):
    """One-time (outside the hot path): transpose PyTorch-layout (A, H) weight
    to (H, A) and pad the action axis up to a multiple of 128 lanes.
    Padded weight columns are 0 and padded bias entries are -1e30 so padded
    logits never affect the log-softmax."""
    A, H = fc_weight.shape
    a_pad = ((A + 127) // 128) * 128
    w_t = jnp.zeros((H, a_pad), jnp.float32).at[:, :A].set(
        fc_weight.astype(jnp.float32).T)
    b = jnp.full((1, a_pad), -1e30, jnp.float32).at[0, :A].set(
        fc_bias.astype(jnp.float32))
    return w_t, b


@partial(jax.jit, static_argnames=("n_actions", "block_b"))
def rnn_policy_forward(state, w_padded, b_padded, *, n_actions, block_b=256):
    """state: (B, n_hidden) f32; (w_padded, b_padded) from prepare_fc_params().
    Returns log-probabilities of shape (B, n_actions)."""
    B, H = state.shape
    A_pad = w_padded.shape[1]

    # Batch tile: full batch if small, else a multiple-of-8 tile so the
    # pipeline can prefetch tile i+1 while computing tile i.
    tb = B if B <= block_b else block_b
    grid = (pl.cdiv(B, tb),)

    cost = pl.CostEstimate(
        flops=2 * B * H * A_pad + 5 * B * A_pad,
        transcendentals=B * (A_pad + 1),
        bytes_accessed=4 * (B * H + H * A_pad + A_pad + B * A_pad),
    )

    out_padded = pl.pallas_call(
        _fc_log_softmax_kernel,
        out_shape=jax.ShapeDtypeStruct((B, A_pad), jnp.float32),
        grid=grid,
        in_specs=[
            pl.BlockSpec((tb, H), lambda i: (i, 0)),      # batch-tiled state
            pl.BlockSpec((H, A_pad), lambda i: (0, 0)),   # VMEM-resident weight
            pl.BlockSpec((1, A_pad), lambda i: (0, 0)),   # VMEM-resident bias
        ],
        out_specs=pl.BlockSpec((tb, A_pad), lambda i: (i, 0)),  # lane-dense store
        compiler_params=pltpu.CompilerParams(
            dimension_semantics=("parallel",)),
        cost_estimate=cost,
    )(state, w_padded, b_padded)

    return out_padded[:, :n_actions]


def reference_forward(state, fc_weight, fc_bias):
    return jax.nn.log_softmax(state @ fc_weight.T + fc_bias, axis=1)


if __name__ == "__main__":
    # Module hyperparameters (small, consistent with the PyTorch __init__).
    n_states, n_hidden, n_actions, batch_size = 4, 32, 3, 8

    key = jax.random.PRNGKey(0)
    k_state, k_big, k_w_ih, k_w_hh, k_fc_w, k_fc_b = jax.random.split(key, 6)

    # Parameter init mirroring __init__ (rnn_cell weights unused by forward()).
    weight_ih = 0.1 * jax.random.normal(k_w_ih, (n_hidden, n_states), jnp.float32)
    weight_hh = 0.1 * jax.random.normal(k_w_hh, (n_hidden, n_hidden), jnp.float32)
    fc_weight = 0.1 * jax.random.normal(k_fc_w, (n_actions, n_hidden), jnp.float32)
    bound = 1.0 / float(jnp.sqrt(jnp.float32(n_hidden)))
    fc_bias = jax.random.uniform(k_fc_b, (n_actions,), jnp.float32, -bound, bound)

    # One-time parameter prep (transpose + lane padding) outside the hot path.
    w_padded, b_padded = prepare_fc_params(fc_weight, fc_bias)

    # Small batch (== module batch_size): single grid step, full-batch tile.
    state = jax.random.normal(k_state, (batch_size, n_hidden), jnp.float32)
    out = jax.block_until_ready(
        rnn_policy_forward(state, w_padded, b_padded, n_actions=n_actions))
    ref = reference_forward(state, fc_weight, fc_bias)
    assert out.shape == (batch_size, n_actions)
    assert jnp.allclose(out, ref, atol=1e-5, rtol=1e-5)
    # Log-probs must exponentiate to a distribution over actions.
    assert jnp.allclose(jnp.sum(jnp.exp(out), axis=1), 1.0, atol=1e-5)

    # Larger batch: exercises the batch grid (4 tiles of 256 rows) with the
    # weight/bias VMEM-resident and the pipelined "parallel" batch axis.
    big_b = 1024
    state_big = jax.random.normal(k_big, (big_b, n_hidden), jnp.float32)
    out_big = jax.block_until_ready(
        rnn_policy_forward(state_big, w_padded, b_padded, n_actions=n_actions))
    ref_big = reference_forward(state_big, fc_weight, fc_bias)
    assert out_big.shape == (big_b, n_actions)
    assert jnp.allclose(out_big, ref_big, atol=1e-5, rtol=1e-5)

    print("KERNEL_OK")
</pallas_src>

<mosaic_0001>
module attributes {stable_mosaic.version = 11 : i64} {
  func.func @_fc_log_softmax_kernel(%arg0: i32, %arg1: memref<8x32xf32, #tpu.memory_space<vmem>>, %arg2: memref<32x128xf32, #tpu.memory_space<vmem>>, %arg3: memref<1x128xf32, #tpu.memory_space<vmem>>, %arg4: memref<8x128xf32, #tpu.memory_space<vmem>>) attributes {dimension_semantics = [#tpu.dimension_semantics<parallel>], iteration_bounds = array<i64: 1>, scalar_prefetch = 0 : i64, scratch_operands = 0 : i64, tpu.core_type = #tpu.core_type<tc>, window_params = [{transform_indices = @transform_0, window_bounds = array<i64: 8, 32>}, {pipeline_mode = #tpu.pipeline_mode<synchronous>, transform_indices = @transform_1, window_bounds = array<i64: 32, 128>}, {pipeline_mode = #tpu.pipeline_mode<synchronous>, transform_indices = @transform_2, window_bounds = array<i64: 1, 128>}, {transform_indices = @transform_3, window_bounds = array<i64: 8, 128>}]} {
    %c0 = arith.constant 0 : index
    %c0_0 = arith.constant 0 : index
    %0 = vector.load %arg1[%c0, %c0_0] : memref<8x32xf32, #tpu.memory_space<vmem>>, vector<8x32xf32>
    %c0_1 = arith.constant 0 : index
    %c0_2 = arith.constant 0 : index
    %1 = vector.load %arg2[%c0_1, %c0_2] : memref<32x128xf32, #tpu.memory_space<vmem>>, vector<32x128xf32>
    %cst = arith.constant dense<0.000000e+00> : vector<8x128xf32>
    %2 = tpu.matmul %0, %1, %cst {dimension_numbers = #tpu.dot_dimension_numbers<[1], [0], [0], [1], [0, 0, 1, 1], [], []>} : vector<8x32xf32>, vector<32x128xf32>, vector<8x128xf32> -> vector<8x128xf32>
    %c0_3 = arith.constant 0 : index
    %c0_4 = arith.constant 0 : index
    %3 = vector.load %arg3[%c0_3, %c0_4] : memref<1x128xf32, #tpu.memory_space<vmem>>, vector<1x128xf32>
    %4 = vector.broadcast %3 : vector<1x128xf32> to vector<8x128xf32>
    %5 = arith.addf %2, %4 : vector<8x128xf32>
    %cst_5 = arith.constant dense<0xFF800000> : vector<8xf32>
    %6 = vector.multi_reduction <maximumf>, %5, %cst_5 [1] : vector<8x128xf32> to vector<8xf32>
    %7 = vector.shape_cast %6 : vector<8xf32> to vector<8x1xf32>
    %8 = vector.broadcast %7 : vector<8x1xf32> to vector<8x128xf32>
    %9 = arith.subf %5, %8 : vector<8x128xf32>
    %10 = math.exp %9 : vector<8x128xf32>
    %cst_6 = arith.constant dense<0.000000e+00> : vector<8xf32>
    %11 = vector.multi_reduction <add>, %10, %cst_6 [1] : vector<8x128xf32> to vector<8xf32>
    %12 = vector.shape_cast %11 : vector<8xf32> to vector<8x1xf32>
    %13 = math.log %12 : vector<8x1xf32>
    %14 = vector.broadcast %13 : vector<8x1xf32> to vector<8x128xf32>
    %15 = arith.subf %9, %14 : vector<8x128xf32>
    %c0_7 = arith.constant 0 : index
    %c0_8 = arith.constant 0 : index
    %16 = vector.load %arg4[%c0_7, %c0_8] : memref<8x128xf32, #tpu.memory_space<vmem>>, vector<8x128xf32>
    tpu.vector_store %arg4[%c0_7, %c0_8], %15 {strides = array<i32>} : memref<8x128xf32, #tpu.memory_space<vmem>>, vector<8x128xf32>,
    return
  }
  func.func @transform_0(%arg0: i32) -> (i32, i32) {
    %c0_i32 = arith.constant 0 : i32
    %c0_i32_0 = arith.constant 0 : i32
    return %arg0, %c0_i32 : i32, i32
  }
  func.func @transform_1(%arg0: i32) -> (i32, i32) {
    %c0_i32 = arith.constant 0 : i32
    %c0_i32_0 = arith.constant 0 : i32
    %c0_i32_1 = arith.constant 0 : i32
    return %c0_i32, %c0_i32_0 : i32, i32
  }
  func.func @transform_2(%arg0: i32) -> (i32, i32) {
    %c0_i32 = arith.constant 0 : i32
    %c0_i32_0 = arith.constant 0 : i32
    %c0_i32_1 = arith.constant 0 : i32
    return %c0_i32, %c0_i32_0 : i32, i32
  }
  func.func @transform_3(%arg0: i32) -> (i32, i32) {
    %c0_i32 = arith.constant 0 : i32
    %c0_i32_0 = arith.constant 0 : i32
    return %arg0, %c0_i32 : i32, i32
  }
}

</mosaic_0001>

<bundles_post_ra>
// kernel: rnn_policy_forward.1
= control target key start
LH: loop header
LB: loop body
LE: loop exit
PB: predicated region body
PF: predicated region fallthrough
CT: control target
= control target key end

     0   :  { %8 = vsyncpa [#allocation3], 0  ;;  %s290_s0 = inlined_call_operand.hbm [shape: f32[8,32], index: 0, kind: input, shape index: {}]   ;;  %s291_s1 = inlined_call_operand.hbm [shape: f32[32,128], index: 1, kind: input, shape index: {}]   ;;  %s292_s2 = inlined_call_operand.vmem [shape: f32[1,128], index: 2, kind: input, shape index: {}]   ;;  %s293_s3 = inlined_call_operand.vmem [shape: f32[8,128], index: 3, kind: output, shape index: {}]  }
   0x1   :  { %9 = vsyncpa [#allocation5], 0  ;;  %s226_s12 = smov [#allocation2]   ;;  %s227_s14 = smov [#allocation4]  }
   0x2   :  { %s16_s13 = sshll.u32 %s226_s12, 4  ;;  %s25_s15 = sshll.u32 %s227_s14, 4  ;;  %s17_s13 = int_to_ptr.vmem [resolvable:$true] %s16_s13  ;;  %s253_s15 = int_to_ptr.vmem [resolvable:$true] %s25_s15 }
   0x3   :  { %s178_s18 = scalar_lea.hbm %s290_s0, 128 }
   0x4   :  { %p179_p0 = scmp.ne.s32.totalorder %s290_s0, %s178_s18  ;;  %p182_p1 = scmp.lt.u32.totalorder %s178_s18, %s290_s0 }
   0x6   :  { %p184_p2 = pnand %p182_p1, %p179_p0 }
   0x8   :  { %187 = shalt.err (!%p184_p2)
}
   0x9   :  { %s188_s23 = scalar_lea.vmem %s17_s13, 128  ;;  %p193_p4 = scmp.lt.s32.totalorder %s17_s13, %s17_s13 }
   0xa   :  { %p189_p3 = scmp.ne.s32.totalorder %s17_s13, %s188_s23  ;;  %p194_p5 = scmp.lt.s32.totalorder %s188_s23, %s188_s23 }
   0xc   :  { %p195_p6 = por %p194_p5, %p193_p4 }
   0xe   :  { %p196_p7 = pnand %p195_p6, %p189_p3 }
  0x10   :  { %199 = shalt.err (!%p196_p7)
}
  0x11   :  { %19 = dma.hbm_to_vmem [thread:$0]  %s290_s0, 128, %s17_s13, [#allocation3]  }
  0x12   :  { %s200_s28 = scalar_lea.hbm %s291_s1, 512 }
  0x13   :  { %p201_p8 = scmp.ne.s32.totalorder %s291_s1, %s200_s28  ;;  %p204_p9 = scmp.lt.u32.totalorder %s200_s28, %s291_s1 }
  0x15   :  { %p206_p10 = pnand %p204_p9, %p201_p8 }
  0x17   :  { %209 = shalt.err (!%p206_p10)
}
  0x18   :  { %s210_s6 = scalar_lea.vmem %s253_s15, 512  ;;  %p215_p12 = scmp.lt.s32.totalorder %s253_s15, %s253_s15 }
  0x19   :  { %p211_p11 = scmp.ne.s32.totalorder %s253_s15, %s210_s6  ;;  %p216_p13 = scmp.lt.s32.totalorder %s210_s6, %s210_s6 }
  0x1b   :  { %p217_p0 = por %p216_p13, %p215_p12 }
  0x1d   :  { %p218_p1 = pnand %p217_p0, %p211_p11 }
  0x1f   :  { %221 = shalt.err (!%p218_p1)
}
  0x20   :  { %s228_s0 = smov 128   ;;  %s229_s7 = smov 8  }
  0x21   :  { %31 = dma.hbm_to_vmem [thread:$0]  %s291_s1, 512, %s253_s15, [#allocation5], %s228_s0, %s228_s0, %s229_s7  }
  0x22   :  { %222 = dma.done.wait [#allocation3], 128  }
  0x23   :  { %223 = vsyncadd [#allocation3], 4294967168 }
  0x24   :  { %224 = dma.done.wait [#allocation5], 512  }
  0x25   :  { %225 = vsyncadd [#allocation5], 4294966784  ;;  %v230_v0 = vmov 0.0|0.0   ;;  %vm231_vm0 = vmmov 0   ;;  %v232_v1 = vmov 0.0   ;;  %v41_v2 = vld [vmem:[#allocation4] sm:$0xff] }
  0x26   :  { %161 = vmatprep.subr.bf16.mxu0 %v230_v0  ;;  %158 = vmatprep.mubr.msk.f32.mxu0 %vm231_vm0, %v232_v1  ;;  %v42_v3 = vld [vmem:[#allocation4 + $0x8] sm:$0xff]  ;;  %v43_v4 = vld [vmem:[#allocation4 + $0x10] sm:$0xff]  ;;  %v44_v6 = vld [vmem:[#allocation4 + $0x18] sm:$0xff]  ;;  %vm52_vm1 = vcmask 261120  }
  0x27   :  { %v162_v5 = vpack.c.bf16 %v42_v3, %v41_v2  ;;  %v165_v7 = vpack.c.bf16 %v44_v6, %v43_v4  ;;  %v40_v8 = vld [vmem:[#allocation2] sm:$0xff] }
  0x28   :  { %v143_v9 = vld [vmem:[%s292_s2] ss:$0 sm:$0xff] }
  0x29   :  { %163 = vmatpush3.bf16.msra.mxu0 %v162_v5 }
  0x2a   :  { %164 = vmatprep.subr.bf16.mxu0 %v230_v0 }
  0x2d   :  { %166 = vmatpush3.bf16.msra.mxu0 %v165_v7 }
  0x30   :  { %159 = vmatmul.mubr.msk.f32.vlgmr.msra.gmra.mrb[0].mxu0 %vm52_vm1, %v40_v8 }
 0x103   :  { %v122_v10 = vpop.f32.mrb[0].mxu0 }
 0x104   :  { %v123_v11 = vadd.f32 %v143_v9, %v122_v10  ;;  %v160_v12 = vpop.f32.mrb[1].mxu0 }
 0x106   :  { %126 = vmax.xlane.f32.xlu0 %v123_v11 }
 0x193   :  { %v127_v13 = vpop.xlane.xlu0 %126 }
 0x194   :  { %v128_v14 = vsub.f32 %v123_v11, %v127_v13 }
 0x196   :  { %v129_v15 = vmul.f32 1.442695, %v128_v14 }
 0x198   :  { %174 = vpow2.f32 %v129_v15 }
 0x1a2   :  { %v175_v16 = vpop.eup %174 }
 0x1a3   :  { %131 = vadd.xlane.f32.xlu0 %v175_v16 }
 0x230   :  { %v132_v17 = vpop.xlane.xlu0 %131 }
 0x231   :  { %176 = vlog2.f32 %v132_v17 }
 0x23b   :  { %v177_v18 = vpop.eup %176 }
 0x23c   :  { %v134_v19 = vmul.f32 0.6931472, %v177_v18 }
 0x23e   :  { %v135_v20 = vsub.f32 %v128_v14, %v134_v19 }
 0x240   :  { %136 = vst [vmem:[%s293_s3] sm:$0xff] %v135_v20 }
 0x241   :  { %141 = vsyncpa [#allocation3], 1 }
 0x242   :  { %142 = vsyncpa [#allocation5], 1 }

</bundles_post_ra>
